<compile_context>
chip_gen: v5e
topology: v5e:2x2
jax: 0.10.0
libtpu: 0.0.40
codegen_flags: <defaults>
</compile_context>

<pallas_src>
import math
from functools import partial

import jax
import jax.numpy as jnp
from jax.experimental import pallas as pl
from jax.experimental.pallas import tpu as pltpu


_STRIP_ROWS = 8  # output rows per inner strip (keeps temporaries vreg-friendly)


def _round_up(x, m):
    return (x + m - 1) // m * m


def _choose_batch_tile(b, per_image_bytes, target_bytes=1 << 20):
    """Images per grid step: big enough to amortize per-step overhead, small
    enough to keep blocks modest, and (when b allows) >= 2 grid steps so both
    v7x TensorCores get work."""
    bt = int(max(1, min(b, target_bytes // max(per_image_bytes, 1))))
    while b % bt:
        bt -= 1
    if b >= 2 and b // bt < 2:
        bt = max(1, b // 2)
        while b % bt:
            bt -= 1
    return bt


def _pos_inject_kernel(x_ref, w_ref, b_ref, o_ref, xp_ref, *, H, W, C, Wp, BT):
    """One block of BT images per grid step.

    x_ref : (BT, H, W, C)    input block (NHWC)
    w_ref : (9, C)           depthwise 3x3 taps, row ki*3+kj; center tap has +1
    b_ref : (1, C)           conv bias (accumulator init)
    o_ref : (BT, H, W, C)    output block
    xp_ref: (BT, H+2, Wp, C) scratch: image rows in [1, H], cols [0, W);
                             rows 0 / H+1 and cols [W, Wp) are a zero halo.
    """
    zdt = xp_ref.dtype
    # Re-zero ONLY the halo each step (the interior is fully overwritten
    # below, so this stays correct when the grid is sharded across cores).
    xp_ref[:, 0:1, :, :] = jnp.zeros((BT, 1, Wp, C), zdt)
    xp_ref[:, H + 1:H + 2, :, :] = jnp.zeros((BT, 1, Wp, C), zdt)
    xp_ref[:, 1:H + 1, W:Wp, :] = jnp.zeros((BT, H, Wp - W, C), zdt)
    # Stage the interior (single VMEM->VMEM copy).
    # TODO(synk): DMA the HBM block straight into this interior window
    # (memory_space=pl.ANY + make_async_copy double buffer) to drop this copy.
    xp_ref[:, 1:H + 1, 0:W, :] = x_ref[...]

    w = w_ref[...]                      # (9, C), single hoisted load
    wk = [w[k] for k in range(9)]       # 9 x (C,) taps, hoisted out of loops
    bias = b_ref[...]                   # (1, C); broadcasts on the first add

    # 3x3 depthwise conv = 9 shifted multiply-adds, processed in row strips so
    # accumulator / roll temporaries stay strip-sized (never image-sized).
    for r0 in range(0, H, _STRIP_ROWS):
        sr = min(_STRIP_ROWS, H - r0)
        acc = bias
        for ki in range(3):
            rows = xp_ref[:, r0 + ki:r0 + ki + sr, :, :]   # (BT, sr, Wp, C)
            rows = rows.reshape(BT * sr, Wp, C)            # free leading merge
            for kj in range(3):
                dj = kj - 1
                if dj == 0:
                    tap = rows
                else:
                    # Cyclic sublane roll; zero guard columns supply the image
                    # boundary, so no edge masks are needed.
                    tap = pltpu.roll(rows, shift=(-dj) % Wp, axis=1)
                acc = acc + tap * wk[ki * 3 + kj]
        acc = acc.reshape(BT, sr, Wp, C)
        o_ref[:, r0:r0 + sr, :, :] = acc[:, :, 0:W, :].astype(o_ref.dtype)


def pos_inject_layer(x, weight, bias, *, acc_dtype=jnp.float32):
    """Pallas TPU forward of PosInjectLayer.

    x:      (b, num_tokens, c)  with num_tokens a perfect square.
    weight: (c, 1, 3, 3)        PyTorch depthwise Conv2d weight layout.
    bias:   (c,)
    acc_dtype: accumulation dtype. Keep f32 on v5e (no bf16 VPU); with bf16
               inputs on v6e/v7x, jnp.bfloat16 roughly doubles VALU throughput.
    returns (b, num_tokens, c)
    """
    b, num_tokens, c = x.shape
    h = int(math.sqrt(num_tokens))
    assert h * h == num_tokens
    assert weight.shape == (c, 1, 3, 3)
    assert bias.shape == (c,)

    # Token t -> spatial (t // h, t % h); the NHWC view is a pure reshape.
    x_sp = x.reshape(b, h, h, c)

    # (c,1,3,3) -> (9,c); fold the +1 residual into the center tap in f32.
    w9 = jnp.transpose(weight.astype(jnp.float32).reshape(c, 3, 3),
                       (1, 2, 0)).reshape(9, c)
    w9 = (w9.at[4].add(1.0)).astype(acc_dtype)
    b2 = bias.astype(acc_dtype).reshape(1, c)

    # Guard-padded scratch width: >= 1 zero guard column for the roll boundary,
    # multiple of 8 so the sublane roll stays native.
    # TODO(synk): when h % 8 == 0 the extra guard vreg is ~8/h wasted VALU
    # work; evaluate Wp = h+1 (non-native roll) for those widths.
    wp = _round_up(h + 1, 8)

    itemsize = jnp.dtype(x.dtype).itemsize
    bt = _choose_batch_tile(b, h * h * c * itemsize)
    grid = (b // bt,)

    kernel = partial(_pos_inject_kernel, H=h, W=h, C=c, Wp=wp, BT=bt)

    # Scoped-VMEM sizing from the actual working set, capped at 48 MiB so we
    # never claim all of v7x's 64 MiB physical VMEM.
    acc_itemsize = jnp.dtype(acc_dtype).itemsize
    blk = bt * h * h * c * itemsize
    scratch_bytes = bt * (h + 2) * wp * c * itemsize
    strip_bytes = bt * min(_STRIP_ROWS, h) * wp * c * acc_itemsize
    param_bytes = 10 * c * acc_itemsize
    needed = 4 * blk + scratch_bytes + 4 * strip_bytes + 2 * param_bytes
    vmem_limit = int(min(max(needed * 3 // 2, 32 * 1024 * 1024),
                         48 * 1024 * 1024))

    # TODO(synk): for c < 128 pack 128//c images into the lane dim (lane-dense
    # output stores); for very large h*c add an H-strip grid axis with an
    # overlapping 1-row halo so per-strip blocks fit v7x VMEM.
    out = pl.pallas_call(
        kernel,
        out_shape=jax.ShapeDtypeStruct((b, h, h, c), x.dtype),
        grid_spec=pltpu.PrefetchScalarGridSpec(
            num_scalar_prefetch=0,
            grid=grid,
            in_specs=[
                pl.BlockSpec((bt, h, h, c), lambda i: (i, 0, 0, 0)),
                pl.BlockSpec((9, c), lambda i: (0, 0)),
                pl.BlockSpec((1, c), lambda i: (0, 0)),
            ],
            out_specs=pl.BlockSpec((bt, h, h, c), lambda i: (i, 0, 0, 0)),
            scratch_shapes=[pltpu.VMEM((bt, h + 2, wp, c), x.dtype)],
        ),
        compiler_params=pltpu.CompilerParams(
            dimension_semantics=("parallel",),
            vmem_limit_bytes=vmem_limit,
        ),
        cost_estimate=pl.CostEstimate(
            flops=18 * b * h * h * c,
            transcendentals=0,
            bytes_accessed=2 * b * h * h * c * itemsize + param_bytes,
        ),
    )(x_sp, w9, b2)

    return out.reshape(b, num_tokens, c)


def _reference(x, weight, bias):
    """Pure-JAX reference matching the PyTorch module (torch weight layout)."""
    b, num_tokens, c = x.shape
    h = int(math.sqrt(num_tokens))
    x_nchw = jnp.transpose(x, (0, 2, 1)).reshape(b, c, h, h)
    w_hwio = jnp.transpose(weight, (2, 3, 1, 0))   # (c,1,3,3) -> (3,3,1,c)
    y = jax.lax.conv_general_dilated(
        x_nchw, w_hwio,
        window_strides=(1, 1), padding=((1, 1), (1, 1)),
        dimension_numbers=("NCHW", "HWIO", "NCHW"),
        feature_group_count=c)
    y = y + bias.reshape(1, c, 1, 1) + x_nchw
    return jnp.transpose(y.reshape(b, c, num_tokens), (0, 2, 1))


if __name__ == "__main__":
    key = jax.random.PRNGKey(0)
    k_x, k_w, k_b = jax.random.split(key, 3)

    b, num_tokens, c = 2, 16, 32          # h = 4
    x = jax.random.normal(k_x, (b, num_tokens, c), dtype=jnp.float32)

    # PyTorch depthwise Conv2d parameter layout: weight (c, 1, 3, 3), bias (c,)
    fan_in = 1 * 3 * 3
    bound = 1.0 / math.sqrt(fan_in)
    weight = jax.random.uniform(k_w, (c, 1, 3, 3), dtype=jnp.float32,
                                minval=-bound, maxval=bound)
    bias = jax.random.uniform(k_b, (c,), dtype=jnp.float32,
                              minval=-bound, maxval=bound)

    out = jax.block_until_ready(pos_inject_layer(x, weight, bias))
    ref = jax.block_until_ready(_reference(x, weight, bias))

    assert out.shape == (b, num_tokens, c)
    assert jnp.allclose(out, ref, atol=1e-5, rtol=1e-5), \
        float(jnp.max(jnp.abs(out - ref)))

    print("KERNEL_OK")
</pallas_src>

<mosaic_0001>
module attributes {stable_mosaic.version = 11 : i64} {
  func.func @_pos_inject_kernel(%arg0: i32, %arg1: memref<1x4x4x32xf32, #tpu.memory_space<vmem>>, %arg2: memref<9x32xf32, #tpu.memory_space<vmem>>, %arg3: memref<1x32xf32, #tpu.memory_space<vmem>>, %arg4: memref<1x4x4x32xf32, #tpu.memory_space<vmem>>, %arg5: memref<1x6x8x32xf32, #tpu.memory_space<vmem>>) attributes {dimension_semantics = [#tpu.dimension_semantics<parallel>], iteration_bounds = array<i64: 2>, scalar_prefetch = 0 : i64, scratch_operands = 1 : i64, tpu.core_type = #tpu.core_type<tc>, window_params = [{transform_indices = @transform_0, window_bounds = array<i64: 1, 4, 4, 32>}, {pipeline_mode = #tpu.pipeline_mode<synchronous>, transform_indices = @transform_1, window_bounds = array<i64: 9, 32>}, {pipeline_mode = #tpu.pipeline_mode<synchronous>, transform_indices = @transform_2, window_bounds = array<i64: 1, 32>}, {transform_indices = @transform_3, window_bounds = array<i64: 1, 4, 4, 32>}]} {
    %cst = arith.constant 0.000000e+00 : f32
    %0 = vector.broadcast %cst : f32 to vector<1x1x8x32xf32>
    %c0 = arith.constant 0 : index
    %c0_0 = arith.constant 0 : index
    %c0_1 = arith.constant 0 : index
    %c0_2 = arith.constant 0 : index
    %1 = vector.load %arg5[%c0, %c0_0, %c0_1, %c0_2] : memref<1x6x8x32xf32, #tpu.memory_space<vmem>>, vector<1x1x8x32xf32>
    tpu.vector_store %arg5[%c0, %c0_0, %c0_1, %c0_2], %0 {strides = array<i32>} : memref<1x6x8x32xf32, #tpu.memory_space<vmem>>, vector<1x1x8x32xf32>,
    %cst_3 = arith.constant 0.000000e+00 : f32
    %2 = vector.broadcast %cst_3 : f32 to vector<1x1x8x32xf32>
    %c0_4 = arith.constant 0 : index
    %c5 = arith.constant 5 : index
    %c0_5 = arith.constant 0 : index
    %c0_6 = arith.constant 0 : index
    %3 = vector.load %arg5[%c0_4, %c5, %c0_5, %c0_6] : memref<1x6x8x32xf32, #tpu.memory_space<vmem>>, vector<1x1x8x32xf32>
    tpu.vector_store %arg5[%c0_4, %c5, %c0_5, %c0_6], %2 {strides = array<i32>} : memref<1x6x8x32xf32, #tpu.memory_space<vmem>>, vector<1x1x8x32xf32>,
    %cst_7 = arith.constant 0.000000e+00 : f32
    %4 = vector.broadcast %cst_7 : f32 to vector<1x4x4x32xf32>
    %c0_8 = arith.constant 0 : index
    %c1 = arith.constant 1 : index
    %c4 = arith.constant 4 : index
    %c0_9 = arith.constant 0 : index
    %5 = vector.load %arg5[%c0_8, %c1, %c4, %c0_9] : memref<1x6x8x32xf32, #tpu.memory_space<vmem>>, vector<1x4x4x32xf32>
    tpu.vector_store %arg5[%c0_8, %c1, %c4, %c0_9], %4 {strides = array<i32>} : memref<1x6x8x32xf32, #tpu.memory_space<vmem>>, vector<1x4x4x32xf32>,
    %c0_10 = arith.constant 0 : index
    %c0_11 = arith.constant 0 : index
    %c0_12 = arith.constant 0 : index
    %c0_13 = arith.constant 0 : index
    %6 = vector.load %arg1[%c0_10, %c0_11, %c0_12, %c0_13] : memref<1x4x4x32xf32, #tpu.memory_space<vmem>>, vector<1x4x4x32xf32>
    %c0_14 = arith.constant 0 : index
    %c1_15 = arith.constant 1 : index
    %c0_16 = arith.constant 0 : index
    %c0_17 = arith.constant 0 : index
    %7 = vector.load %arg5[%c0_14, %c1_15, %c0_16, %c0_17] : memref<1x6x8x32xf32, #tpu.memory_space<vmem>>, vector<1x4x4x32xf32>
    tpu.vector_store %arg5[%c0_14, %c1_15, %c0_16, %c0_17], %6 {strides = array<i32>} : memref<1x6x8x32xf32, #tpu.memory_space<vmem>>, vector<1x4x4x32xf32>,
    %c0_18 = arith.constant 0 : index
    %c0_19 = arith.constant 0 : index
    %8 = vector.load %arg2[%c0_18, %c0_19] : memref<9x32xf32, #tpu.memory_space<vmem>>, vector<9x32xf32>
    %9 = vector.extract_strided_slice %8 {offsets = [0, 0], sizes = [1, 32], strides = [1, 1]} : vector<9x32xf32> to vector<1x32xf32>
    %10 = vector.shape_cast %9 : vector<1x32xf32> to vector<32xf32>
    %11 = vector.extract_strided_slice %8 {offsets = [1, 0], sizes = [1, 32], strides = [1, 1]} : vector<9x32xf32> to vector<1x32xf32>
    %12 = vector.shape_cast %11 : vector<1x32xf32> to vector<32xf32>
    %13 = vector.extract_strided_slice %8 {offsets = [2, 0], sizes = [1, 32], strides = [1, 1]} : vector<9x32xf32> to vector<1x32xf32>
    %14 = vector.shape_cast %13 : vector<1x32xf32> to vector<32xf32>
    %15 = vector.extract_strided_slice %8 {offsets = [3, 0], sizes = [1, 32], strides = [1, 1]} : vector<9x32xf32> to vector<1x32xf32>
    %16 = vector.shape_cast %15 : vector<1x32xf32> to vector<32xf32>
    %17 = vector.extract_strided_slice %8 {offsets = [4, 0], sizes = [1, 32], strides = [1, 1]} : vector<9x32xf32> to vector<1x32xf32>
    %18 = vector.shape_cast %17 : vector<1x32xf32> to vector<32xf32>
    %19 = vector.extract_strided_slice %8 {offsets = [5, 0], sizes = [1, 32], strides = [1, 1]} : vector<9x32xf32> to vector<1x32xf32>
    %20 = vector.shape_cast %19 : vector<1x32xf32> to vector<32xf32>
    %21 = vector.extract_strided_slice %8 {offsets = [6, 0], sizes = [1, 32], strides = [1, 1]} : vector<9x32xf32> to vector<1x32xf32>
    %22 = vector.shape_cast %21 : vector<1x32xf32> to vector<32xf32>
    %23 = vector.extract_strided_slice %8 {offsets = [7, 0], sizes = [1, 32], strides = [1, 1]} : vector<9x32xf32> to vector<1x32xf32>
    %24 = vector.shape_cast %23 : vector<1x32xf32> to vector<32xf32>
    %25 = vector.extract_strided_slice %8 {offsets = [8, 0], sizes = [1, 32], strides = [1, 1]} : vector<9x32xf32> to vector<1x32xf32>
    %26 = vector.shape_cast %25 : vector<1x32xf32> to vector<32xf32>
    %c0_20 = arith.constant 0 : index
    %c0_21 = arith.constant 0 : index
    %27 = vector.load %arg3[%c0_20, %c0_21] : memref<1x32xf32, #tpu.memory_space<vmem>>, vector<1x32xf32>
    %c0_22 = arith.constant 0 : index
    %c0_23 = arith.constant 0 : index
    %c0_24 = arith.constant 0 : index
    %c0_25 = arith.constant 0 : index
    %28 = vector.load %arg5[%c0_22, %c0_23, %c0_24, %c0_25] : memref<1x6x8x32xf32, #tpu.memory_space<vmem>>, vector<1x4x8x32xf32>
    %29 = vector.shape_cast %28 : vector<1x4x8x32xf32> to vector<4x8x32xf32>
    %c1_i32 = arith.constant 1 : i32
    %30 = tpu.dynamic_rotate %29 by %c1_i32 dim 1 : vector<4x8x32xf32>, i32 -> vector<4x8x32xf32>
    %31 = vector.shape_cast %10 : vector<32xf32> to vector<1x1x32xf32>
    %32 = vector.broadcast %31 : vector<1x1x32xf32> to vector<4x8x32xf32>
    %33 = arith.mulf %30, %32 : vector<4x8x32xf32>
    %34 = vector.shape_cast %27 : vector<1x32xf32> to vector<1x1x32xf32>
    %35 = vector.broadcast %34 : vector<1x1x32xf32> to vector<4x8x32xf32>
    %36 = arith.addf %35, %33 : vector<4x8x32xf32>
    %37 = vector.shape_cast %12 : vector<32xf32> to vector<1x1x32xf32>
    %38 = vector.broadcast %37 : vector<1x1x32xf32> to vector<4x8x32xf32>
    %39 = arith.mulf %29, %38 : vector<4x8x32xf32>
    %40 = arith.addf %36, %39 : vector<4x8x32xf32>
    %c7_i32 = arith.constant 7 : i32
    %41 = tpu.dynamic_rotate %29 by %c7_i32 dim 1 : vector<4x8x32xf32>, i32 -> vector<4x8x32xf32>
    %42 = vector.shape_cast %14 : vector<32xf32> to vector<1x1x32xf32>
    %43 = vector.broadcast %42 : vector<1x1x32xf32> to vector<4x8x32xf32>
    %44 = arith.mulf %41, %43 : vector<4x8x32xf32>
    %45 = arith.addf %40, %44 : vector<4x8x32xf32>
    %c0_26 = arith.constant 0 : index
    %c1_27 = arith.constant 1 : index
    %c0_28 = arith.constant 0 : index
    %c0_29 = arith.constant 0 : index
    %46 = vector.load %arg5[%c0_26, %c1_27, %c0_28, %c0_29] : memref<1x6x8x32xf32, #tpu.memory_space<vmem>>, vector<1x4x8x32xf32>
    %47 = vector.shape_cast %46 : vector<1x4x8x32xf32> to vector<4x8x32xf32>
    %c1_i32_30 = arith.constant 1 : i32
    %48 = tpu.dynamic_rotate %47 by %c1_i32_30 dim 1 : vector<4x8x32xf32>, i32 -> vector<4x8x32xf32>
    %49 = vector.shape_cast %16 : vector<32xf32> to vector<1x1x32xf32>
    %50 = vector.broadcast %49 : vector<1x1x32xf32> to vector<4x8x32xf32>
    %51 = arith.mulf %48, %50 : vector<4x8x32xf32>
    %52 = arith.addf %45, %51 : vector<4x8x32xf32>
    %53 = vector.shape_cast %18 : vector<32xf32> to vector<1x1x32xf32>
    %54 = vector.broadcast %53 : vector<1x1x32xf32> to vector<4x8x32xf32>
    %55 = arith.mulf %47, %54 : vector<4x8x32xf32>
    %56 = arith.addf %52, %55 : vector<4x8x32xf32>
    %c7_i32_31 = arith.constant 7 : i32
    %57 = tpu.dynamic_rotate %47 by %c7_i32_31 dim 1 : vector<4x8x32xf32>, i32 -> vector<4x8x32xf32>
    %58 = vector.shape_cast %20 : vector<32xf32> to vector<1x1x32xf32>
    %59 = vector.broadcast %58 : vector<1x1x32xf32> to vector<4x8x32xf32>
    %60 = arith.mulf %57, %59 : vector<4x8x32xf32>
    %61 = arith.addf %56, %60 : vector<4x8x32xf32>
    %c0_32 = arith.constant 0 : index
    %c2 = arith.constant 2 : index
    %c0_33 = arith.constant 0 : index
    %c0_34 = arith.constant 0 : index
    %62 = vector.load %arg5[%c0_32, %c2, %c0_33, %c0_34] : memref<1x6x8x32xf32, #tpu.memory_space<vmem>>, vector<1x4x8x32xf32>
    %63 = vector.shape_cast %62 : vector<1x4x8x32xf32> to vector<4x8x32xf32>
    %c1_i32_35 = arith.constant 1 : i32
    %64 = tpu.dynamic_rotate %63 by %c1_i32_35 dim 1 : vector<4x8x32xf32>, i32 -> vector<4x8x32xf32>
    %65 = vector.shape_cast %22 : vector<32xf32> to vector<1x1x32xf32>
    %66 = vector.broadcast %65 : vector<1x1x32xf32> to vector<4x8x32xf32>
    %67 = arith.mulf %64, %66 : vector<4x8x32xf32>
    %68 = arith.addf %61, %67 : vector<4x8x32xf32>
    %69 = vector.shape_cast %24 : vector<32xf32> to vector<1x1x32xf32>
    %70 = vector.broadcast %69 : vector<1x1x32xf32> to vector<4x8x32xf32>
    %71 = arith.mulf %63, %70 : vector<4x8x32xf32>
    %72 = arith.addf %68, %71 : vector<4x8x32xf32>
    %c7_i32_36 = arith.constant 7 : i32
    %73 = tpu.dynamic_rotate %63 by %c7_i32_36 dim 1 : vector<4x8x32xf32>, i32 -> vector<4x8x32xf32>
    %74 = vector.shape_cast %26 : vector<32xf32> to vector<1x1x32xf32>
    %75 = vector.broadcast %74 : vector<1x1x32xf32> to vector<4x8x32xf32>
    %76 = arith.mulf %73, %75 : vector<4x8x32xf32>
    %77 = arith.addf %72, %76 : vector<4x8x32xf32>
    %78 = vector.shape_cast %77 : vector<4x8x32xf32> to vector<1x4x8x32xf32>
    %79 = vector.extract_strided_slice %78 {offsets = [0, 0, 0, 0], sizes = [1, 4, 4, 32], strides = [1, 1, 1, 1]} : vector<1x4x8x32xf32> to vector<1x4x4x32xf32>
    %c0_37 = arith.constant 0 : index
    %c0_38 = arith.constant 0 : index
    %c0_39 = arith.constant 0 : index
    %c0_40 = arith.constant 0 : index
    %80 = vector.load %arg4[%c0_37, %c0_38, %c0_39, %c0_40] : memref<1x4x4x32xf32, #tpu.memory_space<vmem>>, vector<1x4x4x32xf32>
    tpu.vector_store %arg4[%c0_37, %c0_38, %c0_39, %c0_40], %79 {strides = array<i32>} : memref<1x4x4x32xf32, #tpu.memory_space<vmem>>, vector<1x4x4x32xf32>,
    return
  }
  func.func @transform_0(%arg0: i32) -> (i32, i32, i32, i32) {
    %c0_i32 = arith.constant 0 : i32
    %c0_i32_0 = arith.constant 0 : i32
    %c0_i32_1 = arith.constant 0 : i32
    %c0_i32_2 = arith.constant 0 : i32
    return %arg0, %c0_i32, %c0_i32_0, %c0_i32_1 : i32, i32, i32, i32
  }
  func.func @transform_1(%arg0: i32) -> (i32, i32) {
    %c0_i32 = arith.constant 0 : i32
    %c0_i32_0 = arith.constant 0 : i32
    %c0_i32_1 = arith.constant 0 : i32
    return %c0_i32, %c0_i32_0 : i32, i32
  }
  func.func @transform_2(%arg0: i32) -> (i32, i32) {
    %c0_i32 = arith.constant 0 : i32
    %c0_i32_0 = arith.constant 0 : i32
    %c0_i32_1 = arith.constant 0 : i32
    return %c0_i32, %c0_i32_0 : i32, i32
  }
  func.func @transform_3(%arg0: i32) -> (i32, i32, i32, i32) {
    %c0_i32 = arith.constant 0 : i32
    %c0_i32_0 = arith.constant 0 : i32
    %c0_i32_1 = arith.constant 0 : i32
    %c0_i32_2 = arith.constant 0 : i32
    return %arg0, %c0_i32, %c0_i32_0, %c0_i32_1 : i32, i32, i32, i32
  }
}

</mosaic_0001>

<bundles_post_ra>
// kernel: tpu_custom_call.1
= control target key start
LH: loop header
LB: loop body
LE: loop exit
PB: predicated region body
PF: predicated region fallthrough
CT: control target
= control target key end

     0   :  { %8 = vsyncpa [#allocation4], 0  ;;  %s893_s0 = inlined_call_operand.hbm [shape: f32[2,4,4,32], index: 0, kind: input, shape index: {}]   ;;  %s894_s1 = inlined_call_operand.hbm [shape: f32[9,32], index: 1, kind: input, shape index: {}]   ;;  %s895_s2 = inlined_call_operand.vmem [shape: f32[1,32], index: 2, kind: input, shape index: {}]   ;;  %s896_s3 = inlined_call_operand.hbm [shape: f32[2,4,4,32], index: 3, kind: output, shape index: {}]  }
   0x1   :  { %10 = vsyncpa [#allocation4 + $0x1], 0 }
   0x2   :  { %11 = vsyncpa [#allocation7], 0 }
   0x3   :  { %12 = vsyncpa [#allocation5], 0 }
   0x4   :  { %14 = vsyncpa [#allocation5 + $0x1], 0  ;;  %s697_s12 = smov 0   ;;  %s699_s13 = smov 0  }
   0x5   :  { %s701_s14 = smov 0   ;;  %s703_s15 = smov 0  }
   0x6 LB: > { %s718_s16 = sadd.s32 4294967295, %s667_s15   ;;  %s453_s17 = sadd.s32 4294967294, %s667_s15   ;;  %s667_s15 = sphi %s703_s15, %s906_s15   ;;  %s663_s14 = sphi %s701_s14, %s905_s14   ;;  %s659_s13 = sphi %s699_s13, %s904_s13   ;;  %s655_s12 = sphi %s697_s12, %s903_s12  }
   0x7   : > { %p40_p0 = scmp.ne.s32.totalorder %s659_s13, %s655_s12  ;;  %p41_p1 = scmp.eq.s32.totalorder %s718_s16, 0 }
   0x8   : > { %p106_p2 = scmp.eq.s32.totalorder %s718_s16, 1  ;;  %p112_p3 = scmp.eq.s32.totalorder %s453_s17, 1 }
   0x9   : > { %p727_p4 = por %p41_p1, %p40_p0  ;;  %p454_p5 = scmp.ge.s32.totalorder %s667_s15, 1 }
   0xa   : > { %p732_p6 = por %p112_p3, %p40_p0  ;;  %p119_p7 = scmp.lt.s32.totalorder %s667_s15, 3 }
   0xb   : > { %s130_s22 = sshll.u32 %s894_s1, 4  ;;  %s669_s24 = smov [#allocation6]   ;;  %s131_s22 = int_to_ptr.hbm [resolvable:$true] %s130_s22 }
   0xc   : > { %p740_p8 = pnand %p454_p5, %p119_p7  ;;  %s132_s25 = sshll.u32 %s669_s24, 4  ;;  %s133_s25 = int_to_ptr.vmem [resolvable:$true] %s132_s25 }
   0xd   : > { %s750_s26 = sadd.s32 1, %s667_s15   ;;  %s670_s27 = smov 128  }
   0xe   : > { %p479_p9 = pneg %p740_p8  ;;  %s671_s28 = smov 8  }
   0xf   : > { %s24_s29 = ssub.s32 %s667_s15, %s750_s26  ;;  %s27_s30 = sadd.s32 1, %s663_s14 }
  0x10   : > { %p480_p10 = pnand %p479_p9, %p41_p1  ;;  %p25_p12 = scmp.eq.s32.totalorder %s24_s29, 0 }
  0x11   : > { %p34_p13 = scmp.ne.s32.totalorder %s663_s14, %s659_s13  ;;  %p35_p0 = scmp.eq.s32.totalorder %s667_s15, 0 }
  0x12   : > { %482 = dma.hbm_to_vmem [thread:$0]  (!%p480_p10), %s131_s22, 256, %s133_s25, [#allocation7], %s670_s27, %s670_s27, %s671_s28  }
  0x13   : > { %p492_p3 = scmp.lt.s32.totalorder %s667_s15, 2  ;;  %p36_p5 = por %p35_p0, %p34_p13 }
  0x14   : > { %s760_s4 = scalar_select %p25_p12, %s663_s14, %s27_s30  }
  0x15   : > { %p764_p7 = por %p106_p2, %p34_p13  ;;  %s149_s6 = sand.u32 1, %s663_s14  }
  0x16   : > { %s469_s7 = sshll.u32 %s667_s15, 4  ;;  %s457_s8 = sshll.u32 %s149_s6, 4 }
  0x17   : > { %s158_s11 = scalar_lea.hbm %s893_s0, %s469_s7  ;;  %s153_s20 = scalar_lea.vmem [#allocation3], %s457_s8 }
  0x18   : > { %s159_s17 = sshll.u32 %s158_s11, 4  ;;  %s161_s21 = sshll.u32 %s153_s20, 4  ;;  %s160_s17 = int_to_ptr.hbm [resolvable:$true] %s159_s17  ;;  %s162_s21 = int_to_ptr.vmem [resolvable:$true] %s161_s21 }
  0x19   : > { %p775_p9 = pnand %p492_p3, %p36_p5  ;;  %s150_s24 = scalar_lea.sflag [#allocation4], %s149_s6 }
  0x1a   : > { %s567_s25 = sshra.s32 %s160_s17, 4  ;;  %s574_s30 = scalar_lea.hbm %s893_s0, 32  ;;  %s568_s25 = int_to_ptr.hbm [resolvable:$true] %s567_s25 }
  0x1b   : > { %s569_s27 = scalar_lea.hbm %s568_s25, 16  ;;  %p571_p10 = pneg %p775_p9 }
  0x1c   : > { %p570_p2 = scmp.ne.s32.totalorder %s568_s25, %s569_s27  ;;  %p575_p0 = scmp.lt.s32.totalorder %s568_s25, %s893_s0 }
  0x1d   : > { %p576_p3 = scmp.lt.s32.totalorder %s574_s30, %s569_s27 }
  0x1e   : > { %p572_p12 = pnand %p571_p10, %p570_p2 }
  0x1f   : > { %p577_p5 = por %p576_p3, %p575_p0 }
  0x20   : > { %p573_p13 = pneg %p572_p12 }
  0x22   : > { %p578_p11 = pnand %p577_p5, %p573_p13 }
  0x24   : > { %581 = shalt.err (!%p578_p11)
}
  0x25   : > { %s672_s6 = smov 64   ;;  %s673_s9 = smov 4  }
  0x26   : > { %486 = dma.hbm_to_vmem [thread:$0]  (!%p775_p9), %s160_s17, 256, %s162_s21, %s150_s24, %s672_s6, %s672_s6, %s673_s9  }
  0x27   : > { %173 = sbr.rel (%p740_p8) target bundleno = 92 (0x5c), region = 32  ;;  %s792_s10 = sand.u32 (!%p740_p8), 1, %s659_s13  }
  0x28   : > { %s461_s11 = sshll.u32 (!%p740_p8), %s792_s10, 4  ;;  %s176_s20 = scalar_lea.sflag (!%p740_p8), [#allocation4], %s792_s10 }
  0x29   : > { %s179_s25 = scalar_lea.vmem (!%p740_p8), [#allocation3], %s461_s11 }
  0x2c   : > { %642 = dma.done.wait (%p727_p4), %s176_s20, 256  }
  0x2d   : > { %644 = vsyncadd (%p727_p4), %s176_s20, 4294967040 }
  0x2e   : > { %646 = dma.done.wait (%p41_p1), [#allocation7], 256  }
  0x2f   : > { %648 = vsyncadd (%p41_p1), [#allocation7], 4294967040  ;;  %vm208_vm0 = vcmask 261120   ;;  %vm213_vm1 = vcmask 257024   ;;  %v674_v0 = vmov 0.0   ;;  %v226_v5 = vld [vmem:[#allocation6] sm:$0xff] }
  0x30   : > { %209 = vst.msk [vmem:[#allocation2] sm:$0xff] %vm208_vm0, %v674_v0  ;;  %v218_v1 = vld [vmem:[%s179_s25] sm:$0xf]  ;;  %v219_v2 = vld [vmem:[%s179_s25 + $0x4] sm:$0xf]  ;;  %v237_v8 = vperm.slane %v226_v5, 0 }
  0x31   : > { %211 = vst.msk [vmem:[#allocation2 + $0x28] sm:$0xff] %vm208_vm0, %v674_v0  ;;  %v220_v3 = vld [vmem:[%s179_s25 + $0x8] sm:$0xf]  ;;  %v221_v4 = vld [vmem:[%s179_s25 + $0xc] sm:$0xf]  ;;  %v249_v10 = vperm.slane %v226_v5, 1 }
  0x32   : > { %214 = vst.msk [vmem:[#allocation2 + $0xc] sm:$0xf] %vm213_vm1, %v674_v0  ;;  %v535_v9 = vld [vmem:[%s895_s2] ss:$0 sm:$0xff]  ;;  %v262_v12 = vperm.slane %v226_v5, 2  ;;  %v279_v17 = vperm.slane %v226_v5, 3 }
  0x33   : > { %215 = vst.msk [vmem:[#allocation2 + $0x14] sm:$0xf] %vm213_vm1, %v674_v0  ;;  %v817_v21 = vperm.slane %v226_v5, 4  ;;  %v819_v24 = vperm.slane %v226_v5, 5  ;;  %v821_v29 = vperm.slane %v226_v5, 6  ;;  %v823_v30 = vperm.slane %v226_v5, 7 }
  0x34   : > { %216 = vst.msk [vmem:[#allocation2 + $0x1c] sm:$0xf] %vm213_vm1, %v674_v0  ;;  %v828_v44 = vld [vmem:[#allocation6 + $0x8] ss:$0 sm:$0xff]  ;;  %s839_s17 = scalar_lea.vmem [#allocation8], %s461_s11  ;;  %s470_s21 = sshll.u32 %s718_s16, 4 }
  0x35   : > { %217 = vst.msk [vmem:[#allocation2 + $0x24] sm:$0xf] %vm213_vm1, %v674_v0  ;;  %s366_s27 = scalar_lea.hbm %s896_s3, %s470_s21  ;;  %s367_s16 = sshll.u32 %s839_s17, 4  ;;  %s368_s16 = int_to_ptr.vmem [resolvable:$true] %s367_s16 }
  0x36   : > { %222 = vst.msk [vmem:[#allocation2 + $0x8] sm:$0xf] %vm213_vm1, %v218_v1  ;;  %s369_s28 = sshll.u32 %s366_s27, 4  ;;  %s355_s29 = scalar_lea.sflag [#allocation5], %s792_s10  ;;  %s370_s28 = int_to_ptr.hbm [resolvable:$true] %s369_s28 }
  0x37   : > { %v229_v6 = vld [vmem:[#allocation2] sm:$0xff]  ;;  %223 = vst.msk [vmem:[#allocation2 + $0x10] sm:$0xf] %vm213_vm1, %v219_v2  ;;  %s611_s30 = sshra.s32 %s370_s28, 4  ;;  %s617_s9 = scalar_lea.hbm %s896_s3, 32  ;;  %s612_s30 = int_to_ptr.hbm [resolvable:$true] %s611_s30 }
  0x38   : > { %224 = vst.msk [vmem:[#allocation2 + $0x18] sm:$0xf] %vm213_vm1, %v220_v3  ;;  %v233_v7 = vrot.slane %v229_v6, 7  ;;  %v258_v11 = vrot.slane %v229_v6, 1  ;;  %v250_v14 = vmul.f32 %v249_v10, %v229_v6  ;;  %s613_s7 = scalar_lea.hbm %s612_s30, 16  ;;  %p618_p11 = scmp.lt.s32.totalorder %s612_s30, %s896_s3 }
  0x39   : > { %225 = vst.msk [vmem:[#allocation2 + $0x20] sm:$0xf] %vm213_vm1, %v221_v4  ;;  %v314_v4 = vld [vmem:[#allocation2 + $0x28] sm:$0xff]  ;;  %p614_p1 = scmp.ne.s32.totalorder %s612_s30, %s613_s7  ;;  %p619_p9 = scmp.lt.s32.totalorder %s617_s9, %s613_s7 }
  0x3a   : > { %v238_v13 = vmul.f32 %v237_v8, %v233_v7  ;;  %v263_v16 = vmul.f32 %v262_v12, %v258_v11 }
  0x3b   : > { %p615_p4 = pnand %p614_p1, %p764_p7  ;;  %p620_p2 = por %p619_p9, %p618_p11 }
  0x3c   : > { %v245_v15 = vadd.f32 %v535_v9, %v238_v13 }
  0x3d   : > { %v271_v18 = vld [vmem:[#allocation2 + $0x8] sm:$0xff]  ;;  %p616_p8 = pneg %p615_p4 }
  0x3e   : > { %v254_v19 = vadd.f32 %v250_v14, %v245_v15  ;;  %v275_v20 = vrot.slane %v271_v18, 7  ;;  %v311_v22 = vld [vmem:[#allocation2 + $0x10] sm:$0xff]  ;;  %v297_v23 = vrot.slane %v271_v18, 1  ;;  %v289_v33 = vmul.f32 %v817_v21, %v271_v18 }
  0x3f   : > { %v315_v25 = vrot.slane %v311_v22, 7  ;;  %v312_v31 = vld [vmem:[#allocation2 + $0x18] sm:$0xff]  ;;  %v251_v35 = vmul.f32 %v271_v18, %v249_v10  ;;  %v337_v37 = vrot.slane %v311_v22, 1  ;;  %v329_v43 = vmul.f32 %v823_v30, %v311_v22  ;;  %p621_p10 = pnand %p620_p2, %p616_p8 }
  0x40   : > { %v267_v26 = vadd.f32 %v263_v16, %v254_v19  ;;  %v280_v27 = vmul.f32 %v279_v17, %v275_v20  ;;  %v239_v28 = vmul.f32 %v275_v20, %v237_v8  ;;  %v302_v36 = vmul.f32 %v819_v24, %v297_v23  ;;  %v313_v47 = vld [vmem:[#allocation2 + $0x20] sm:$0xff] }
  0x41   : > { %v240_v38 = vmul.f32 %v315_v25, %v237_v8  ;;  %v264_v41 = vmul.f32 %v297_v23, %v262_v12  ;;  %v316_v42 = vrot.slane %v312_v31, 7  ;;  %v252_v46 = vmul.f32 %v311_v22, %v249_v10 }
  0x42   : > { %v284_v32 = vadd.f32 %v280_v27, %v267_v26  ;;  %v246_v34 = vadd.f32 %v535_v9, %v239_v28  ;;  %v320_v49 = vmul.f32 %v821_v29, %v315_v25  ;;  %v281_v51 = vmul.f32 %v315_v25, %v279_v17 }
  0x43   : > { %v247_v45 = vadd.f32 %v535_v9, %v240_v38  ;;  %v290_v52 = vmul.f32 %v311_v22, %v817_v21  ;;  %v338_v53 = vrot.slane %v312_v31, 1  ;;  %v265_v55 = vmul.f32 %v337_v37, %v262_v12 }
  0x44   : > { %v293_v39 = vadd.f32 %v289_v33, %v284_v32  ;;  %v255_v40 = vadd.f32 %v251_v35, %v246_v34  ;;  %v317_v58 = vrot.slane %v313_v47, 7  ;;  %v241_v59 = vmul.f32 %v316_v42, %v237_v8 }
  0x45   : > { %v256_v54 = vadd.f32 %v252_v46, %v247_v45  ;;  %v342_v60 = vmul.f32 %v828_v44, %v337_v37  ;;  %v303_v61 = vmul.f32 %v337_v37, %v819_v24  ;;  %v282_v63 = vmul.f32 %v316_v42, %v279_v17 }
  0x46   : > { %v306_v48 = vadd.f32 %v302_v36, %v293_v39  ;;  %v268_v50 = vadd.f32 %v264_v41, %v255_v40  ;;  %v248_v2 = vadd.f32 %v535_v9, %v241_v59  ;;  %v253_v3 = vmul.f32 %v312_v31, %v249_v10 }
  0x47   : > { %v269_v62 = vadd.f32 %v265_v55, %v256_v54  ;;  %v321_v5 = vmul.f32 %v821_v29, %v316_v42  ;;  %v291_v7 = vmul.f32 %v312_v31, %v817_v21  ;;  %v266_v11 = vmul.f32 %v338_v53, %v262_v12 }
  0x48   : > { %v324_v56 = vadd.f32 %v320_v49, %v306_v48  ;;  %v285_v57 = vadd.f32 %v281_v51, %v268_v50  ;;  %v257_v14 = vadd.f32 %v253_v3, %v248_v2  ;;  %v283_v15 = vmul.f32 %v317_v58, %v279_v17 }
  0x49   : > { %v286_v6 = vadd.f32 %v282_v63, %v269_v62  ;;  %v304_v18 = vmul.f32 %v338_v53, %v819_v24  ;;  %v318_v19 = vrot.slane %v314_v4, 7  ;;  %v330_v10 = vmul.f32 %v823_v30, %v312_v31 }
  0x4a   : > { %v333_v0 = vadd.f32 %v329_v43, %v324_v56  ;;  %v294_v1 = vadd.f32 %v290_v52, %v285_v57  ;;  %v339_v20 = vrot.slane %v313_v47, 1  ;;  %v270_v12 = vadd.f32 %v266_v11, %v257_v14 }
  0x4b   : > { %v295_v16 = vadd.f32 %v291_v7, %v286_v6  ;;  %v322_v17 = vmul.f32 %v821_v29, %v317_v58  ;;  %v343_v25 = vmul.f32 %v828_v44, %v338_v53  ;;  %v292_v27 = vmul.f32 %v313_v47, %v817_v21 }
  0x4c   : > { %v346_v13 = vadd.f32 %v342_v60, %v333_v0  ;;  %v307_v8 = vadd.f32 %v303_v61, %v294_v1  ;;  %v287_v26 = vadd.f32 %v283_v15, %v270_v12  ;;  %v331_v32 = vmul.f32 %v823_v30, %v313_v47 }
  0x4d   : > { %v308_v22 = vadd.f32 %v304_v18, %v295_v16  ;;  %v305_v34 = vmul.f32 %v339_v20, %v819_v24  ;;  %v323_v35 = vmul.f32 %v821_v29, %v318_v19  ;;  %v344_v37 = vmul.f32 %v828_v44, %v339_v20 }
  0x4e   : > { %350 = vst.msk [vmem:[%s839_s17] sm:$0xf] %vm213_vm1, %v346_v13  ;;  %v325_v9 = vadd.f32 %v321_v5, %v307_v8  ;;  %v296_v31 = vadd.f32 %v292_v27, %v287_v26  ;;  %v340_v21 = vrot.slane %v314_v4, 1  ;;  %v332_v24 = vmul.f32 %v823_v30, %v314_v4 }
  0x4f   : > { %v326_v28 = vadd.f32 %v322_v17, %v308_v22 }
  0x50   : > { %v334_v23 = vadd.f32 %v330_v10, %v325_v9  ;;  %v309_v38 = vadd.f32 %v305_v34, %v296_v31  ;;  %v345_v41 = vmul.f32 %v828_v44, %v340_v21 }
  0x51   : > { %v335_v36 = vadd.f32 %v331_v32, %v326_v28 }
  0x52   : > { %v347_v33 = vadd.f32 %v343_v25, %v334_v23  ;;  %v327_v40 = vadd.f32 %v323_v35, %v309_v38 }
  0x53   : > { %v348_v39 = vadd.f32 %v344_v37, %v335_v36 }
  0x54   : > { %351 = vst.msk [vmem:[%s839_s17 + $0x4] sm:$0xf] %vm213_vm1, %v347_v33  ;;  %v336_v29 = vadd.f32 %v332_v24, %v327_v40 }
  0x55   : > { %352 = vst.msk [vmem:[%s839_s17 + $0x8] sm:$0xf] %vm213_vm1, %v348_v39 }
  0x56   : > { %v349_v42 = vadd.f32 %v345_v41, %v336_v29 }
  0x58   : > { %353 = vst.msk [vmem:[%s839_s17 + $0xc] sm:$0xf] %vm213_vm1, %v349_v42 }
  0x59   : > { %624 = shalt.err (!%p621_p10)
}
  0x5a   : > { %s675_s10 = smov 64   ;;  %s676_s25 = smov 4  }
  0x5b   : > { %477 = dma.vmem_to_hbm [thread:$0]  (%p764_p7), %s368_s16, 256, %s370_s28, %s355_s29, %s675_s10, %s675_s10, %s676_s25  }
  0x5c PF: > { %s384_s18 = sand.u32 1, %s655_s12   ;;  %p902_p12 = scmp.ge.s32.totalorder %s667_s15, 2 }
  0x5d   : > { %s385_s23 = scalar_lea.sflag [#allocation5], %s384_s18 }
  0x5e   : > { %p488_p13 = pnand %p902_p12, %p732_p6 }
  0x60   : > { %p489_p0 = pneg %p488_p13 }
  0x62   : > { %650 = dma.done.wait (%p489_p0), %s385_s23, 256  }
  0x63   : > { %652 = vsyncadd (%p489_p0), %s385_s23, 4294967040  ;;  %p17_p3 = scmp.ge.s32.totalorder %s750_s26, 4   ;;  %s903_s12 = smov %s659_s13 }
  0x64   : > { %s904_s13 = smov %s663_s14  ;;  %s905_s14 = smov %s760_s4 }
  0x65   : > { %s906_s15 = smov %s750_s26  ;;  %19 = sbr.rel (!%p17_p3) target bundleno = 6 (0x6), region = 84 }
  0x6a   :  { %391 = vsyncpa [#allocation4], 1 }
  0x6b   :  { %393 = vsyncpa [#allocation4 + $0x1], 1 }
  0x6c   :  { %394 = vsyncpa [#allocation7], 1 }
  0x6d   :  { %395 = vsyncpa [#allocation5], 1 }
  0x6e   :  { %397 = vsyncpa [#allocation5 + $0x1], 1 }

</bundles_post_ra>
